<compile_context>
chip_gen: v5e
topology: v5e:2x2
jax: 0.10.0
libtpu: 0.0.40
codegen_flags: <defaults>
</compile_context>

<pallas_src>
import functools

import numpy as np
import jax
import jax.numpy as jnp
from jax import lax
from jax.experimental import pallas as pl
from jax.experimental.pallas import tpu as pltpu


# --------------------------------------------------------------------------- helpers
_TAPS = tuple((ky - 1, kx - 1) for ky in range(3) for kx in range(3))


def _resize_matrix(out_size, in_size):
    """Dense matrix reproducing F.interpolate(mode='bilinear', align_corners=False)."""
    A = np.zeros((out_size, in_size), np.float32)
    scale = in_size / out_size
    for d in range(out_size):
        src = (d + 0.5) * scale - 0.5
        src = max(src, 0.0)
        i0 = min(int(np.floor(src)), in_size - 1)
        i1 = min(i0 + 1, in_size - 1)
        l1 = src - i0
        A[d, i0] += 1.0 - l1
        A[d, i1] += l1
    return A


def _tap_masks(H, W, nb):
    """(9, nb*H*W) 0/1 masks: tap t valid at (h, w) iff (h+oy, w+ox) is inside the image.
    Tiled nb times along lanes so lane-folded batch items mask their own borders (the
    roll wrap between adjacent folded images lands exactly on masked-out positions)."""
    h = np.arange(H)[:, None]
    w = np.arange(W)[None, :]
    m = np.zeros((9, H * W), np.float32)
    for t, (oy, ox) in enumerate(_TAPS):
        valid = (h + oy >= 0) & (h + oy < H) & (w + ox >= 0) & (w + ox < W)
        m[t] = valid.astype(np.float32).reshape(-1)
    return np.tile(m, (1, nb))


@functools.lru_cache(maxsize=None)
def _roll_sign():
    """+1 if pltpu.roll follows jnp.roll's convention (positive shift moves data to
    higher indices), -1 otherwise.  Cached, one tiny probe launch at first trace."""
    def probe(x_ref, o_ref):
        o_ref[...] = pltpu.roll(x_ref[...], 1, 1)

    x = jnp.arange(8 * 128, dtype=jnp.float32).reshape(8, 128)
    y = pl.pallas_call(probe, out_shape=jax.ShapeDtypeStruct((8, 128), jnp.float32))(x)
    v = float(y[0, 1])
    if v == float(x[0, 0]):
        return 1
    if v == float(x[0, 2]):
        return -1
    raise RuntimeError("could not determine pltpu.roll convention")


# --------------------------------------------------------------------------- wrapper
def uafm_forward(x_high, x_low, p, batch_fold=1):
    """UAFM forward (u_type='sp').  x_high: (N, Ch, Hin, Win), x_low: (N, Cl, H, W)."""
    N, Cl, H, W = x_low.shape
    _, Ch, Hin, Win = x_high.shape
    Co = p['wout'].shape[0]
    HW = H * W

    nb = batch_fold
    assert N % nb == 0, "batch_fold must divide the batch size"
    G = N // nb          # grid length
    L = nb * HW          # lanes per grid step (nb images concatenated along lanes)

    # ---- separable bilinear resize (align_corners=False), done in the wrapper ---------
    Ah = jnp.asarray(_resize_matrix(H, Hin))           # (H, Hin)
    Aw = jnp.asarray(_resize_matrix(W, Win))           # (W, Win)
    x_hi = jnp.einsum('wj,ncij->nciw', Aw, x_high)     # width pass
    x_hi = jnp.einsum('hi,nciw->nchw', Ah, x_hi).reshape(N, Ch, HW)
    x_lo_flat = x_low.reshape(N, Cl, HW)

    def fold(x, C):        # (N, C, HW) -> (G, C, nb*HW), lane index = b_local*HW + pixel
        return x.reshape(G, nb, C, HW).transpose(0, 2, 1, 3).reshape(G, C, L)

    xh_f = fold(x_hi, Ch)
    xl_f = fold(x_lo_flat, Cl)

    mask = jnp.asarray(_tap_masks(H, W, nb))           # (9, L) f32

    # ---- pack the two MXU convs: BN scale folded into weights, bias in the last column --
    KW = 9 * max(Cl, Ch)                               # tap-weight columns (9*cin, max)

    def fold_conv(w, scale, bias):
        cout, cin = w.shape[:2]
        wt = (jnp.transpose(w, (0, 2, 3, 1)) * scale.reshape(cout, 1, 1, 1))  # (co,ky,kx,ci)
        wt = jnp.pad(wt.reshape(cout, 9 * cin), ((0, 0), (0, KW - 9 * cin)))
        return jnp.concatenate([wt, bias.reshape(cout, 1)], axis=1)           # (co, KW+1)

    W_packed = jnp.concatenate([
        fold_conv(p['wlow'], p['slow'], p['blow']),    # rows [0, Ch)       (conv_low)
        fold_conv(p['wout'], p['sout'], p['bout']),    # rows [Ch, Ch+Co)   (conv_out)
    ], axis=0)                                          # (Ch+Co, KW+1) f32

    # ---- pack the tiny attention convs as per-(co, tap) weight columns (VPU path) -------
    def fold_small(w, scale):
        cout, cin = w.shape[:2]
        wt = jnp.transpose(w, (1, 0, 2, 3)) * scale.reshape(1, cout, 1, 1)    # (ci,co,ky,kx)
        return wt.reshape(cin, cout * 9)                                      # col = co*9+t

    A1_COL, A1_B, A2_COL, A2_B, WA_COLS = 0, 18, 20, 29, 30
    WA = jnp.zeros((4, WA_COLS), jnp.float32)
    WA = WA.at[:, A1_COL:A1_COL + 18].set(fold_small(p['wa1'], p['sa1']))
    WA = WA.at[0:1, A1_B:A1_B + 2].set(p['ba1'].reshape(1, 2))
    WA = WA.at[0:2, A2_COL:A2_COL + 9].set(fold_small(p['wa2'], p['sa2']))
    WA = WA.at[0:1, A2_B:A2_B + 1].set(p['ba2'].reshape(1, 1))

    sign = _roll_sign()

    # ---- kernel --------------------------------------------------------------------------
    def kernel(xh_ref, xl_ref, mask_ref, w_ref, wa_ref, o_ref, xs_ref, att_ref):
        mask_all = mask_ref[...]          # (9, L) hoisted into vregs once per grid step
        wa = wa_ref[...]                  # (4, WA_COLS) attention-conv params

        def taps_of(x):
            # 9 shifted (+ boundary-masked) copies of x (cin, L); centre tap needs no mask.
            out = []
            for t, (oy, ox) in enumerate(_TAPS):
                d = oy * W + ox
                if d == 0:
                    out.append(x)
                else:
                    out.append(pltpu.roll(x, (-sign * d) % L, 1) * mask_all[t:t + 1, :])
            return out

        def conv_mxu(x, row0, cout, relu):
            # 3x3 conv + folded BN on the MXU.  Taps are packed at stride == cin so the
            # matmul RHS slice is exactly the rows written here (no zero-init needed).
            cin = x.shape[0]
            tp = taps_of(x)
            for t in range(9):
                xs_ref[pl.ds(t * cin, cin), :] = tp[t]
            w = w_ref[pl.ds(row0, cout), pl.ds(0, 9 * cin)]          # (cout, 9*cin) f32
            b = w_ref[pl.ds(row0, cout), pl.ds(KW, 1)]               # (cout, 1) BN bias
            y = jnp.dot(w, xs_ref[pl.ds(0, 9 * cin), :],
                        preferred_element_type=jnp.float32) + b
            return jnp.maximum(y, 0.0) if relu else y

        def conv_vpu(src_row, cin, col0, bcol, cout, dst_row, relu):
            # Tiny 3x3 conv (cin<=4, cout<=2) on the VPU/XLU: 9 rolled taps, per-(co,tap)
            # weight columns, sublane-reduce over cin, BN bias add.  No MXU, no staging.
            x = att_ref[pl.ds(src_row, cin), :]
            tp = taps_of(x)
            last = None
            for co in range(cout):
                acc = None
                for t in range(9):
                    c = col0 + co * 9 + t
                    term = wa[0:cin, c:c + 1] * tp[t]
                    acc = term if acc is None else acc + term
                row = (jnp.sum(acc, axis=0, keepdims=True)
                       + wa[0:1, bcol + co:bcol + co + 1])
                if relu:
                    row = jnp.maximum(row, 0.0)
                if dst_row is None:
                    last = row
                else:
                    att_ref[pl.ds(dst_row + co, 1), :] = row
            return last

        x_hi = xh_ref[...]                                   # (Ch, L), resized in wrapper
        x_lo = conv_mxu(xl_ref[...], 0, Ch, relu=True)       # conv_low (ConvX 3x3)

        # spatial-attention input rows, torch order: [max_h, mean_h, max_l, mean_l]
        att_ref[pl.ds(0, 1), :] = jnp.max(x_hi, axis=0, keepdims=True)
        att_ref[pl.ds(1, 1), :] = jnp.mean(x_hi, axis=0, keepdims=True)
        att_ref[pl.ds(2, 1), :] = jnp.max(x_lo, axis=0, keepdims=True)
        att_ref[pl.ds(3, 1), :] = jnp.mean(x_lo, axis=0, keepdims=True)

        # conv_atten: ConvX(4,2,3) -> Conv2d(2,1,3,bias=False)+BN(1) -> sigmoid
        conv_vpu(0, 4, A1_COL, A1_B, 2, dst_row=4, relu=True)
        a = conv_vpu(4, 2, A2_COL, A2_B, 1, dst_row=None, relu=False)
        atten = pl.reciprocal(1.0 + jnp.exp(-a), approx=True)          # (1, L), EUP only

        fused = x_lo + atten * (x_hi - x_lo)                 # == xh*a + xl*(1-a)
        o_ref[...] = conv_mxu(fused, Ch, Co, relu=True)      # conv_out (ConvX 3x3)

    # ---- pallas_call -----------------------------------------------------------------------
    def invariant(arr):
        return pl.BlockSpec(arr.shape, lambda g: (0, 0))

    def per_batch(c):
        return pl.BlockSpec((None, c, L), lambda g: (g, 0, 0))

    xs_rows = 9 * max(Cl, Ch)
    blk_bytes = 4 * L * (Ch + Cl + Co)                             # per-step data blocks
    inv_bytes = 4 * (mask.size + W_packed.size + WA.size)          # invariant inputs
    scr_bytes = 4 * L * (xs_rows + 8)                              # VMEM scratch
    vmem_limit = int(min(64 << 20,
                         max(8 << 20, 4 * (blk_bytes + inv_bytes) + 2 * scr_bytes)))

    out = pl.pallas_call(
        kernel,
        out_shape=jax.ShapeDtypeStruct((G, Co, L), jnp.float32),
        grid=(G,),
        in_specs=[
            per_batch(Ch),            # x_high, bilinearly resized + flattened (+folded)
            per_batch(Cl),            # x_low, flattened (+folded)
            invariant(mask),          # 3x3 tap boundary masks
            invariant(W_packed),      # conv_low + conv_out weights (BN folded) + biases
            invariant(WA),            # attention-conv weights/biases (VPU path)
        ],
        out_specs=per_batch(Co),
        scratch_shapes=[
            pltpu.VMEM((xs_rows, L), jnp.float32),   # stacked shifted taps (MXU RHS)
            pltpu.VMEM((8, L), jnp.float32),         # attention rows + conv_a1 output
        ],
        compiler_params=pltpu.CompilerParams(
            dimension_semantics=("parallel",),
            vmem_limit_bytes=vmem_limit,
        ),
    )(xh_f, xl_f, mask, W_packed, WA)

    return out.reshape(G, Co, nb, HW).transpose(0, 2, 1, 3).reshape(N, Co, H, W)


# --------------------------------------------------------------------------- params
def make_params(key, low_chan, high_chan, out_chan):
    """Random inference-mode parameters; conv weights in torch OIHW layout,
    BatchNorm folded to per-channel scale/bias."""
    eps = 1e-5
    ks = jax.random.split(key, 8)

    def bn_fold(k, c):
        k1, k2, k3, k4 = jax.random.split(k, 4)
        gamma = 1.0 + 0.1 * jax.random.normal(k1, (c,), jnp.float32)
        beta = 0.1 * jax.random.normal(k2, (c,), jnp.float32)
        mean = 0.1 * jax.random.normal(k3, (c,), jnp.float32)
        var = jnp.abs(jax.random.normal(k4, (c,), jnp.float32)) + 0.5
        scale = gamma / jnp.sqrt(var + eps)
        bias = beta - mean * scale
        return scale.reshape(c, 1), bias.reshape(c, 1)

    def conv_w(k, cout, cin):
        return 0.2 * jax.random.normal(k, (cout, cin, 3, 3), jnp.float32)  # torch OIHW

    p = {}
    p['wlow'] = conv_w(ks[0], high_chan, low_chan)
    p['slow'], p['blow'] = bn_fold(ks[1], high_chan)
    p['wa1'] = conv_w(ks[2], 2, 4)
    p['sa1'], p['ba1'] = bn_fold(ks[3], 2)
    p['wa2'] = conv_w(ks[4], 1, 2)
    p['sa2'], p['ba2'] = bn_fold(ks[5], 1)
    p['wout'] = conv_w(ks[6], out_chan, high_chan)
    p['sout'], p['bout'] = bn_fold(ks[7], out_chan)
    return p


# --------------------------------------------------------------------------- reference
def uafm_reference(x_high, x_low, p):
    """Pure-JAX f32 reference matching the PyTorch module (inference-mode BN)."""
    _, _, H, W = x_low.shape
    _, _, Hin, Win = x_high.shape
    Ah = jnp.asarray(_resize_matrix(H, Hin))
    Aw = jnp.asarray(_resize_matrix(W, Win))

    def conv_bn(x, w, scale, bias, relu):
        y = lax.conv_general_dilated(x, w, (1, 1), ((1, 1), (1, 1)),
                                     dimension_numbers=('NCHW', 'OIHW', 'NCHW'))
        y = y * scale.reshape(1, -1, 1, 1) + bias.reshape(1, -1, 1, 1)
        return jnp.maximum(y, 0.0) if relu else y

    xl = conv_bn(x_low, p['wlow'], p['slow'], p['blow'], True)
    xh = jnp.einsum('hi,wj,ncij->nchw', Ah, Aw, x_high)

    def sp(x):
        return jnp.concatenate([jnp.max(x, 1, keepdims=True),
                                jnp.mean(x, 1, keepdims=True)], axis=1)

    att = jnp.concatenate([sp(xh), sp(xl)], axis=1)
    a = conv_bn(att, p['wa1'], p['sa1'], p['ba1'], True)
    a = conv_bn(a, p['wa2'], p['sa2'], p['ba2'], False)
    atten = jax.nn.sigmoid(a)
    x = xh * atten + xl * (1.0 - atten)
    return conv_bn(x, p['wout'], p['sout'], p['bout'], True)


# --------------------------------------------------------------------------- main
if __name__ == "__main__":
    N, Cl, Ch, Co = 2, 4, 8, 8        # low_chan=4, hight_chan=8, out_chan=8
    H = W = 16                         # low-level spatial size
    Hin = Win = 8                      # high-level spatial size (upsampled to 16x16)

    key = jax.random.PRNGKey(0)
    k_xh, k_xl, k_p = jax.random.split(key, 3)
    x_high = jax.random.normal(k_xh, (N, Ch, Hin, Win), jnp.float32)
    x_low = jax.random.normal(k_xl, (N, Cl, H, W), jnp.float32)
    params = make_params(k_p, Cl, Ch, Co)

    out = jax.block_until_ready(uafm_forward(x_high, x_low, params))
    ref = jax.block_until_ready(uafm_reference(x_high, x_low, params))

    assert out.shape == (N, Co, H, W)
    # All matmuls run in f32 now; the only approximation is the EUP approx-reciprocal in
    # the sigmoid (~2^-12 relative on the attention map), so the tolerance is modest.
    np.testing.assert_allclose(np.asarray(out), np.asarray(ref), rtol=2e-2, atol=5e-2)

    print("KERNEL_OK")
</pallas_src>

<mosaic_0001>
module attributes {stable_mosaic.version = 11 : i64} {
  func.func @probe(%arg0: memref<8x128xf32, #tpu.memory_space<vmem>>, %arg1: memref<8x128xf32, #tpu.memory_space<vmem>>) attributes {dimension_semantics = [], scalar_prefetch = 0 : i64, scratch_operands = 0 : i64, tpu.core_type = #tpu.core_type<tc>} {
    %c0 = arith.constant 0 : index
    %c0_0 = arith.constant 0 : index
    %0 = vector.load %arg0[%c0, %c0_0] : memref<8x128xf32, #tpu.memory_space<vmem>>, vector<8x128xf32>
    %c1_i32 = arith.constant 1 : i32
    %1 = tpu.dynamic_rotate %0 by %c1_i32 dim 1 : vector<8x128xf32>, i32 -> vector<8x128xf32>
    %c0_1 = arith.constant 0 : index
    %c0_2 = arith.constant 0 : index
    %2 = vector.load %arg1[%c0_1, %c0_2] : memref<8x128xf32, #tpu.memory_space<vmem>>, vector<8x128xf32>
    tpu.vector_store %arg1[%c0_1, %c0_2], %1 {strides = array<i32>} : memref<8x128xf32, #tpu.memory_space<vmem>>, vector<8x128xf32>,
    return
  }
}

</mosaic_0001>

<bundles_post_ra>
// kernel: tpu_custom_call.1
= control target key start
LH: loop header
LB: loop body
LE: loop exit
PB: predicated region body
PF: predicated region fallthrough
CT: control target
= control target key end

     0   :  { %6 = vsyncpa [#allocation3], 0  ;;  %s118_s0 = inlined_call_operand.hbm [shape: f32[8,128], index: 0, kind: input, shape index: {}]   ;;  %s119_s1 = inlined_call_operand.hbm [shape: f32[8,128], index: 1, kind: output, shape index: {}]  }
   0x1   :  { %7 = vsyncpa [#allocation4], 0  ;;  %s13_s8 = sshll.u32 %s118_s0, 4  ;;  %s99_s9 = smov [#allocation2]   ;;  %s14_s8 = int_to_ptr.hbm [resolvable:$true] %s13_s8 }
   0x2   :  { %s15_s10 = sshll.u32 %s99_s9, 4  ;;  %s16_s10 = int_to_ptr.vmem [resolvable:$true] %s15_s10 }
   0x3   :  { %18 = dma.hbm_to_vmem [thread:$0]  %s14_s8, 128, %s16_s10, [#allocation3]  }
   0x4   :  { %95 = dma.done.wait [#allocation3], 128  }
   0x5   :  { %96 = vsyncadd [#allocation3], 4294967168  ;;  %v23_v0 = vld [vmem:[#allocation2] sm:$0xff]  ;;  %s100_s11 = smov 1   ;;  %s101_s12 = smov [#allocation5]  }
   0x6   :  { %24 = vrot.lane.b32.xlu0 %v23_v0, %s100_s11  ;;  %s32_s13 = sshll.u32 %s101_s12, 4  ;;  %s34_s16 = sshll.u32 %s119_s1, 4  ;;  %s33_s13 = int_to_ptr.vmem [resolvable:$true] %s32_s13  ;;  %s35_s16 = int_to_ptr.hbm [resolvable:$true] %s34_s16 }
  0x78   :  { %v25_v1 = vpop.permute.xlu0 %24 }
  0x79   :  { %26 = vst [vmem:[#allocation5] sm:$0xff] %v25_v1 }
  0x7a   :  { %37 = dma.vmem_to_hbm [thread:$0]  %s33_s13, 128, %s35_s16, [#allocation4]  }
  0x7b   :  { %97 = dma.done.wait [#allocation4], 128  }
  0x7c   :  { %98 = vsyncadd [#allocation4], 4294967168 }
  0x7d   :  { %42 = vsyncpa [#allocation3], 1 }
  0x7e   :  { %43 = vsyncpa [#allocation4], 1 }

</bundles_post_ra>
